<compile_context>
chip_gen: v7x
topology: tpu7x:2x2x1
jax: 0.10.0
libtpu: 0.0.40
codegen_flags: <defaults>
</compile_context>

<pallas_src>
import jax
import jax.numpy as jnp
from jax.experimental import pallas as pl
from jax.experimental.pallas import tpu as pltpu


def _neuron_kernel(xt_ref, w_ref, b_ref, o_ref):
    # xt_ref: (D, Bt)  input, batch on the lane axis (lane-dense loads)
    # w_ref : (T, D)   PyTorch-layout weight (no transpose needed)
    # b_ref : (T, 1)   bias column (single lane-broadcast add)
    # o_ref : (T, Bt)  output, batch on the lane axis (lane-dense stores)
    xt = xt_ref[...].astype(jnp.float32)
    w = w_ref[...].astype(jnp.float32)
    b = b_ref[...].astype(jnp.float32)
    D, Bt = xt.shape
    T = w.shape[0]

    if D <= 16:
        # Tiny contraction (n_dims=5): D broadcast FMAs on the VPU.  A (3,5)x(5,B)
        # matmul would use <0.1% of an MXU tile and still pay MXU FIFO latency.
        z = jnp.broadcast_to(b, (T, Bt))  # hoisted once (JAX doesn't CSE broadcasts)
        for d in range(D):                # static unroll; D is a trace-time constant
            z = z + w[:, d:d + 1] * xt[d:d + 1, :]
    else:
        # General path: contraction on last dim of w / first dim of xt -> MXU,
        # f32 accumulate, still no in-kernel transpose.
        z = jnp.dot(w, xt, preferred_element_type=jnp.float32) + b

    # Sigmoid: exp goes to the EUP slot, stays f32 throughout (v5e-safe).
    o_ref[...] = jax.nn.sigmoid(z).astype(o_ref.dtype)


def neuron_forward(x, weight, bias):
    """sigmoid(x @ weight.T + bias).  x: (B, D) f32; weight: (T, D); bias: (T,)."""
    B, D = x.shape
    T, D2 = weight.shape
    assert D == D2

    # Lane-dense layout plumbing (outside the kernel): batch on the lane axis.
    x_t = x.T                     # (D, B)
    b_col = bias.reshape(T, 1)    # (T, 1)

    # Batch tile selection: 512+ lane tiles reach ~85% of HBM roofline; at small
    # B we use a single full-array block with NO grid (no per-step overhead).
    TB = 0
    if B >= 1024:
        for cand in (2048, 1024, 512):   # comfortably under v7x's 64 MiB VMEM
            if B % cand == 0:
                TB = cand
                break

    if TB == 0:
        # Single full-extent block resident in VMEM, gridless.
        out_t = pl.pallas_call(
            _neuron_kernel,
            out_shape=jax.ShapeDtypeStruct((T, B), x.dtype),
            in_specs=[
                pl.BlockSpec(memory_space=pltpu.MemorySpace.VMEM),
                pl.BlockSpec(memory_space=pltpu.MemorySpace.VMEM),
                pl.BlockSpec(memory_space=pltpu.MemorySpace.VMEM),
            ],
            out_specs=pl.BlockSpec(memory_space=pltpu.MemorySpace.VMEM),
        )(x_t, weight, b_col)
    else:
        # Stream the batch in lane-dense tiles; weight/bias stay resident.
        out_t = pl.pallas_call(
            _neuron_kernel,
            out_shape=jax.ShapeDtypeStruct((T, B), x.dtype),
            grid=(B // TB,),
            in_specs=[
                pl.BlockSpec((D, TB), lambda i: (0, i)),
                pl.BlockSpec((T, D), lambda i: (0, 0)),
                pl.BlockSpec((T, 1), lambda i: (0, 0)),
            ],
            out_specs=pl.BlockSpec((T, TB), lambda i: (0, i)),
            compiler_params=pltpu.CompilerParams(
                dimension_semantics=("parallel",),   # v7x megacore split; no-op v5e/v6e
            ),
        )(x_t, weight, b_col)

    return out_t.T                # back to PyTorch's (B, T)


if __name__ == "__main__":
    n_dims, n_targets = 5, 3
    batch = 2

    key = jax.random.PRNGKey(0)
    kx, kw, kb = jax.random.split(key, 3)

    # Deterministic parameter init (mimics Linear's uniform(-1/sqrt(fan_in), ...))
    bound = 1.0 / (n_dims ** 0.5)
    weight = jax.random.uniform(kw, (n_targets, n_dims), jnp.float32, -bound, bound)
    bias = jax.random.uniform(kb, (n_targets,), jnp.float32, -bound, bound)

    x = jax.random.normal(kx, (batch, n_dims), jnp.float32)

    out = neuron_forward(x, weight, bias)
    jax.block_until_ready(out)

    # Pure-JAX reference check
    ref = jax.nn.sigmoid(x @ weight.T + bias)
    assert out.shape == (batch, n_targets)
    assert jnp.allclose(out, ref, atol=1e-5, rtol=1e-5)

    print("KERNEL_OK")
</pallas_src>

<mosaic_0001>
module attributes {stable_mosaic.version = 11 : i64} {
  func.func @_neuron_kernel(%arg0: memref<5x2xf32, #tpu.memory_space<vmem>>, %arg1: memref<3x5xf32, #tpu.memory_space<vmem>>, %arg2: memref<3x1xf32, #tpu.memory_space<vmem>>, %arg3: memref<3x2xf32, #tpu.memory_space<vmem>>) attributes {dimension_semantics = [], scalar_prefetch = 0 : i64, scratch_operands = 0 : i64, tpu.core_type = #tpu.core_type<tc>} {
    %c0 = arith.constant 0 : index
    %c0_0 = arith.constant 0 : index
    %0 = vector.load %arg0[%c0, %c0_0] : memref<5x2xf32, #tpu.memory_space<vmem>>, vector<5x2xf32>
    %c0_1 = arith.constant 0 : index
    %c0_2 = arith.constant 0 : index
    %1 = vector.load %arg1[%c0_1, %c0_2] : memref<3x5xf32, #tpu.memory_space<vmem>>, vector<3x5xf32>
    %c0_3 = arith.constant 0 : index
    %c0_4 = arith.constant 0 : index
    %2 = vector.load %arg2[%c0_3, %c0_4] : memref<3x1xf32, #tpu.memory_space<vmem>>, vector<3x1xf32>
    %3 = vector.shape_cast %2 : vector<3x1xf32> to vector<3x1xf32>
    %4 = vector.broadcast %3 : vector<3x1xf32> to vector<3x2xf32>
    %5 = vector.extract_strided_slice %1 {offsets = [0, 0], sizes = [3, 1], strides = [1, 1]} : vector<3x5xf32> to vector<3x1xf32>
    %6 = vector.extract_strided_slice %0 {offsets = [0, 0], sizes = [1, 2], strides = [1, 1]} : vector<5x2xf32> to vector<1x2xf32>
    %7 = vector.broadcast %5 : vector<3x1xf32> to vector<3x2xf32>
    %8 = vector.broadcast %6 : vector<1x2xf32> to vector<3x2xf32>
    %9 = arith.mulf %7, %8 : vector<3x2xf32>
    %10 = arith.addf %4, %9 : vector<3x2xf32>
    %11 = vector.extract_strided_slice %1 {offsets = [0, 1], sizes = [3, 1], strides = [1, 1]} : vector<3x5xf32> to vector<3x1xf32>
    %12 = vector.extract_strided_slice %0 {offsets = [1, 0], sizes = [1, 2], strides = [1, 1]} : vector<5x2xf32> to vector<1x2xf32>
    %13 = vector.broadcast %11 : vector<3x1xf32> to vector<3x2xf32>
    %14 = vector.broadcast %12 : vector<1x2xf32> to vector<3x2xf32>
    %15 = arith.mulf %13, %14 : vector<3x2xf32>
    %16 = arith.addf %10, %15 : vector<3x2xf32>
    %17 = vector.extract_strided_slice %1 {offsets = [0, 2], sizes = [3, 1], strides = [1, 1]} : vector<3x5xf32> to vector<3x1xf32>
    %18 = vector.extract_strided_slice %0 {offsets = [2, 0], sizes = [1, 2], strides = [1, 1]} : vector<5x2xf32> to vector<1x2xf32>
    %19 = vector.broadcast %17 : vector<3x1xf32> to vector<3x2xf32>
    %20 = vector.broadcast %18 : vector<1x2xf32> to vector<3x2xf32>
    %21 = arith.mulf %19, %20 : vector<3x2xf32>
    %22 = arith.addf %16, %21 : vector<3x2xf32>
    %23 = vector.extract_strided_slice %1 {offsets = [0, 3], sizes = [3, 1], strides = [1, 1]} : vector<3x5xf32> to vector<3x1xf32>
    %24 = vector.extract_strided_slice %0 {offsets = [3, 0], sizes = [1, 2], strides = [1, 1]} : vector<5x2xf32> to vector<1x2xf32>
    %25 = vector.broadcast %23 : vector<3x1xf32> to vector<3x2xf32>
    %26 = vector.broadcast %24 : vector<1x2xf32> to vector<3x2xf32>
    %27 = arith.mulf %25, %26 : vector<3x2xf32>
    %28 = arith.addf %22, %27 : vector<3x2xf32>
    %29 = vector.extract_strided_slice %1 {offsets = [0, 4], sizes = [3, 1], strides = [1, 1]} : vector<3x5xf32> to vector<3x1xf32>
    %30 = vector.extract_strided_slice %0 {offsets = [4, 0], sizes = [1, 2], strides = [1, 1]} : vector<5x2xf32> to vector<1x2xf32>
    %31 = vector.broadcast %29 : vector<3x1xf32> to vector<3x2xf32>
    %32 = vector.broadcast %30 : vector<1x2xf32> to vector<3x2xf32>
    %33 = arith.mulf %31, %32 : vector<3x2xf32>
    %34 = arith.addf %28, %33 : vector<3x2xf32>
    %35 = arith.negf %34 : vector<3x2xf32>
    %36 = math.exp %35 : vector<3x2xf32>
    %cst = arith.constant 1.000000e+00 : f32
    %37 = vector.broadcast %cst : f32 to vector<3x2xf32>
    %38 = arith.addf %37, %36 : vector<3x2xf32>
    %39 = arith.divf %37, %38 : vector<3x2xf32>
    %c0_5 = arith.constant 0 : index
    %c0_6 = arith.constant 0 : index
    %40 = vector.load %arg3[%c0_5, %c0_6] : memref<3x2xf32, #tpu.memory_space<vmem>>, vector<3x2xf32>
    tpu.vector_store %arg3[%c0_5, %c0_6], %39 {strides = array<i32>} : memref<3x2xf32, #tpu.memory_space<vmem>>, vector<3x2xf32>,
    return
  }
}

</mosaic_0001>

<bundles_post_ra>
// kernel: tpu_custom_call.1
= control target key start
LH: loop header
LB: loop body
LE: loop exit
PB: predicated region body
PF: predicated region fallthrough
CT: control target
= control target key end

     0   :  { %v101_v0 = vmov 0   ;;  %v102_v1 = vmov 1   ;;  %v103_v4 = vmov 2   ;;  %v104_v5 = vmov 3   ;;  %s138_s1 = inlined_call_operand.vmem [shape: f32[3,5], index: 1, kind: input, shape index: {}]   ;;  %s139_s2 = inlined_call_operand.vmem [shape: f32[3,1], index: 2, kind: input, shape index: {}]   ;;  %s140_s0 = inlined_call_operand.vmem [shape: f32[5,2], index: 0, kind: input, shape index: {}]   ;;  %s141_s3 = inlined_call_operand.vmem [shape: f32[3,2], index: 3, kind: output, shape index: {}]  }
   0x1   :  { %91 = vset.pattern.permute.xlu0 %v101_v0  ;;  %92 = vset.pattern.permute.xlu1 %v102_v1  ;;  %v15_v2 = vld [vmem:[%s138_s1] sm:$0x7]  ;;  %v105_v6 = vmov 4   ;;  %v27_v7 = vlaneseq  ;;  %vm79_vm0 = vcmask 10240  }
   0x2   :  { %24 = vperm.xlu0 %91, %v15_v2   ;;  %34 = vperm.xlu1 %92, %v15_v2   ;;  %v16_v3 = vld [vmem:[%s139_s2] sm:$0x7] }
   0x3   :  { %v28_v8 = vshrl.u32 %v27_v7, 7  ;;  %v14_v10 = vld [vmem:[%s140_s0] sm:$0x1f] }
   0x5   :  { %v29_v9 = vsub.s32 0, %v28_v8  ;;  %v39_v11 = vsub.s32 1, %v28_v8  ;;  %v49_v12 = vsub.s32 2, %v28_v8  ;;  %v59_v18 = vsub.s32 3, %v28_v8 }
   0x6   :  { %19 = vperm.xlu0 %91, %v16_v3   ;;  %93 = vset.pattern.permute.xlu1 %v103_v4  ;;  %v69_v20 = vsub.s32 4, %v28_v8 }
   0x7   :  { %44 = vperm.xlu1 %93, %v15_v2   ;;  %v30_v13 = vrot.slane %v14_v10, %v29_v9  ;;  %v40_v16 = vrot.slane %v14_v10, %v39_v11  ;;  %v50_v17 = vrot.slane %v14_v10, %v49_v12  ;;  %v60_v26 = vrot.slane %v14_v10, %v59_v18 }
   0x8   :  { %v70_v28 = vrot.slane %v14_v10, %v69_v20 }
   0xa   :  { %94 = vset.pattern.permute.xlu0 %v104_v5 }
   0xb   :  { %54 = vperm.xlu0 %94, %v15_v2   ;;  %95 = vset.pattern.permute.xlu1 %v105_v6 }
   0xc   :  { %64 = vperm.xlu1 %95, %v15_v2  }
   0xf   :  { %96 = vset.pattern.permute.xlu0 %v105_v6 }
  0x81   :  { %v25_v14 = vpop.permute.xlu0 %24  ;;  %v35_v15 = vpop.permute.xlu1 %34 }
  0x82   :  { %v31_v19 = vmul.f32 %v30_v13, %v25_v14  ;;  %v41_v22 = vmul.f32 %v40_v16, %v35_v15 }
  0x85   :  { %v20_v21 = vpop.permute.xlu0 %19 }
  0x86   :  { %v32_v23 = vadd.f32 %v31_v19, %v20_v21  ;;  %v45_v24 = vpop.permute.xlu1 %44 }
  0x87   :  { %v51_v25 = vmul.f32 %v50_v17, %v45_v24 }
  0x88   :  { %v42_v27 = vadd.f32 %v41_v22, %v32_v23 }
  0x8a   :  { %v52_v29 = vadd.f32 %v51_v25, %v42_v27  ;;  %v55_v30 = vpop.permute.xlu0 %54 }
  0x8b   :  { %v61_v31 = vmul.f32 %v60_v26, %v55_v30  ;;  %v65_v32 = vpop.permute.xlu1 %64 }
  0x8c   :  { %v71_v33 = vmul.f32 %v70_v28, %v65_v32 }
  0x8d   :  { %v62_v34 = vadd.f32 %v61_v31, %v52_v29 }
  0x8f   :  { %v72_v35 = vadd.f32 %v71_v33, %v62_v34 }
  0x91   :  { %v85_v36 = vmul.f32 -1.442695, %v72_v35 }
  0x93   :  { %97 = vpow2.f32 %v85_v36 }
  0x9d   :  { %v98_v37 = vpop.eup %97 }
  0x9e   :  { %v76_v38 = vadd.f32 1.0, %v98_v37 }
  0xa0   :  { %99 = vrcp.f32 %v76_v38 }
  0xaa   :  { %v100_v39 = vpop.eup %99 }
  0xab   :  { %80 = vst.msk [vmem:[%s141_s3] sm:$0x7] %vm79_vm0, %v100_v39 }

</bundles_post_ra>
